<compile_context>
chip_gen: v7x
topology: tpu7x:2x2x1
jax: 0.10.0
libtpu: 0.0.40
codegen_flags: <defaults>
</compile_context>

<pallas_src>
import functools

import jax
import jax.numpy as jnp
from jax.experimental import pallas as pl
from jax.experimental.pallas import tpu as pltpu


# -----------------------------------------------------------------------------
# Kernel 1: row-tiled linear (no bias), weight kept in torch [dout, din] layout.
# -----------------------------------------------------------------------------
def _linear_kernel(x_ref, w_ref, o_ref):
    o_ref[...] = jax.lax.dot_general(
        x_ref[...], w_ref[...], (((1,), (1,)), ((), ())),
        preferred_element_type=jnp.float32).astype(o_ref.dtype)


def linear_rows(x, w, *, block_rows=256):
    """x: [rows, din]; w: [dout, din] (torch Linear weight) -> [rows, dout]."""
    rows, din = x.shape
    dout = w.shape[0]
    tm = min(block_rows, rows)
    assert rows % tm == 0 and (tm % 8 == 0 or tm == rows), (rows, tm)
    return pl.pallas_call(
        _linear_kernel,
        out_shape=jax.ShapeDtypeStruct((rows, dout), x.dtype),
        grid=(rows // tm,),
        in_specs=[pl.BlockSpec((tm, din), lambda i: (i, 0)),
                  pl.BlockSpec((dout, din), lambda i: (0, 0))],
        out_specs=pl.BlockSpec((tm, dout), lambda i: (i, 0)),
        compiler_params=pltpu.CompilerParams(
            dimension_semantics=("parallel",)),
    )(x, w)


# -----------------------------------------------------------------------------
# Kernel 2: fused relative attention (scores + rel-shift + softmax + P@V).
# -----------------------------------------------------------------------------
def _rel_shift_in_kernel(bd):
    """Exact Transformer-XL `_rel_shift` of an [L, L] tile, fully in-register.

    Derivation: with the zero-padded matrix P[i] = [0, bd[i,:]], the torch
    pad+reshape trick gives  shifted[i, j] = P_flat[(i+1)*L + j], i.e.
        shifted[i] = [ bd[i, L-1-i:], 0, bd[i+1, :L-2-i] ].
    Build W[i] = [bd[i, :], 0, bd[i+1, :L-1]] (width 2L), then
        shifted[i, j] = W[i, (L-1-i) + j],
    implemented as a uniform left-rotation by (L-1) followed by a per-row
    right-rotation by i done with a log2(L)-stage barrel shifter (only static
    slices / concats / selects -> cheap and layout-friendly).
    """
    L = bd.shape[0]
    dt = bd.dtype
    width = 2 * L
    bd_next = jnp.concatenate([bd[1:, :], jnp.zeros((1, L), dt)], axis=0)
    w_mat = jnp.concatenate(
        [bd, jnp.zeros((L, 1), dt), bd_next[:, :L - 1]], axis=1)          # (L, 2L)
    # uniform left-rotate by (L - 1)
    x = jnp.concatenate([w_mat[:, L - 1:], w_mat[:, :L - 1]], axis=1)
    row_idx = jax.lax.broadcasted_iota(jnp.int32, (L, width), 0)
    shift = 1
    while shift < L:                       # per-row right-rotate by i (barrel shifter)
        x_rot = jnp.concatenate([x[:, width - shift:], x[:, :width - shift]], axis=1)
        x = jnp.where((row_idx & shift) != 0, x_rot, x)
        shift *= 2
    return x[:, :L]


def _attn_kernel(wh_ref, rk_ref, rwb_ref, rrb_ref, o_ref, *, n_head, d_head, scale):
    # wh_ref: (1, qlen, 3*H*D)  packed [q | k | v] heads for one batch element
    # rk_ref: (rlen, H*D);  rwb/rrb: (1, H*D);  o_ref: (1, qlen, H*D)
    L = wh_ref.shape[1]                    # qlen == klen == rlen (no-mems path)
    HD = n_head * d_head
    f32 = jnp.float32
    dn_t = (((1,), (1,)), ((), ()))        # x @ y.T   (contract last dims)
    dn_n = (((1,), (0,)), ((), ()))        # x @ y

    q_all = wh_ref[0, :, 0:HD].astype(f32)             # (L, HD)
    rwq = q_all + rwb_ref[...].astype(f32)             # q + r_w_bias (per-head, lane-wise)
    rrq = q_all + rrb_ref[...].astype(f32)             # q + r_r_bias

    for h in range(n_head):
        s0 = h * d_head
        k_h = wh_ref[0, :, HD + s0:HD + s0 + d_head]          # (L, D)
        v_h = wh_ref[0, :, 2 * HD + s0:2 * HD + s0 + d_head]  # (L, D)
        rk_h = rk_ref[:, s0:s0 + d_head]                      # (L, D)

        ac = jax.lax.dot_general(rwq[:, s0:s0 + d_head], k_h, dn_t,
                                 preferred_element_type=f32)  # (L, L)
        bd = jax.lax.dot_general(rrq[:, s0:s0 + d_head], rk_h, dn_t,
                                 preferred_element_type=f32)  # (L, L)
        bd = _rel_shift_in_kernel(bd)                         # exact rel-shift, no HBM trip

        s = (ac + bd) * scale
        s = s - jnp.max(s, axis=-1, keepdims=True)
        e = jnp.exp(s)
        # NOTE: approx=True would move this fully to the EUP at reduced precision.
        p = e * pl.reciprocal(jnp.sum(e, axis=-1, keepdims=True), approx=False)

        av = jax.lax.dot_general(p.astype(v_h.dtype), v_h, dn_n,
                                 preferred_element_type=f32)  # (L, D)
        o_ref[0, :, s0:s0 + d_head] = av.astype(o_ref.dtype)


def rel_attn_fused(wh3, rk, rwb, rrb, *, n_head, d_head, scale):
    """wh3: [bsz, qlen, 3*H*D]; rk: [rlen, H*D]; rwb/rrb: [1, H*D] -> [bsz, qlen, H*D]."""
    bsz, qlen, three_hd = wh3.shape
    HD = n_head * d_head
    rlen = rk.shape[0]
    assert three_hd == 3 * HD and rlen == qlen
    return pl.pallas_call(
        functools.partial(_attn_kernel, n_head=n_head, d_head=d_head, scale=scale),
        out_shape=jax.ShapeDtypeStruct((bsz, qlen, HD), wh3.dtype),
        grid=(bsz,),
        in_specs=[pl.BlockSpec((1, qlen, three_hd), lambda b: (b, 0, 0)),
                  pl.BlockSpec((rlen, HD), lambda b: (0, 0)),
                  pl.BlockSpec((1, HD), lambda b: (0, 0)),
                  pl.BlockSpec((1, HD), lambda b: (0, 0))],
        out_specs=pl.BlockSpec((1, qlen, HD), lambda b: (b, 0, 0)),
        compiler_params=pltpu.CompilerParams(
            dimension_semantics=("parallel",),
            vmem_limit_bytes=64 * 1024 * 1024),
    )(wh3, rk, rwb, rrb)


# -----------------------------------------------------------------------------
# Kernel 3: fused o-projection + residual + LN + position-wise FFN + residual + LN.
# -----------------------------------------------------------------------------
def _post_kernel(av_ref, x_ref, wo_ref, g1_ref, b1_ref, w1_ref, bb1_ref,
                 w2_ref, bb2_ref, g2_ref, b2_ref, o_ref, *, eps):
    f32 = jnp.float32
    dn_t = (((1,), (1,)), ((), ()))

    attn_out = jax.lax.dot_general(av_ref[...], wo_ref[...], dn_t,
                                   preferred_element_type=f32)          # (tm, dm)
    x = x_ref[...].astype(f32) + attn_out
    mu = jnp.mean(x, axis=-1, keepdims=True)
    var = jnp.mean((x - mu) ** 2, axis=-1, keepdims=True)
    y = (x - mu) * jax.lax.rsqrt(var + eps) * g1_ref[...] + b1_ref[...]

    h = jax.lax.dot_general(y.astype(w1_ref.dtype), w1_ref[...], dn_t,
                            preferred_element_type=f32) + bb1_ref[...]  # (tm, d_inner)
    h = jnp.maximum(h, 0.0)
    core = jax.lax.dot_general(h.astype(w2_ref.dtype), w2_ref[...], dn_t,
                               preferred_element_type=f32) + bb2_ref[...]
    z = y + core
    mu2 = jnp.mean(z, axis=-1, keepdims=True)
    var2 = jnp.mean((z - mu2) ** 2, axis=-1, keepdims=True)
    o_ref[...] = ((z - mu2) * jax.lax.rsqrt(var2 + eps) * g2_ref[...]
                  + b2_ref[...]).astype(o_ref.dtype)


def post_attention_ffn(av2d, x2d, w_o, ln1_g, ln1_b, w_ff1, b_ff1,
                       w_ff2, b_ff2, ln2_g, ln2_b, *, eps, block_rows=256):
    rows, HD = av2d.shape
    d_model = x2d.shape[1]
    d_inner = w_ff1.shape[0]
    tm = min(block_rows, rows)
    assert rows % tm == 0 and (tm % 8 == 0 or tm == rows), (rows, tm)

    row_av = pl.BlockSpec((tm, HD), lambda i: (i, 0))
    row_x = pl.BlockSpec((tm, d_model), lambda i: (i, 0))

    def whole(shape):
        return pl.BlockSpec(shape, lambda i: (0, 0))

    return pl.pallas_call(
        functools.partial(_post_kernel, eps=eps),
        out_shape=jax.ShapeDtypeStruct((rows, d_model), x2d.dtype),
        grid=(rows // tm,),
        in_specs=[row_av, row_x,
                  whole((d_model, HD)),
                  whole((1, d_model)), whole((1, d_model)),
                  whole((d_inner, d_model)), whole((1, d_inner)),
                  whole((d_model, d_inner)), whole((1, d_model)),
                  whole((1, d_model)), whole((1, d_model))],
        out_specs=row_x,
        compiler_params=pltpu.CompilerParams(
            dimension_semantics=("parallel",),
            vmem_limit_bytes=64 * 1024 * 1024),
    )(av2d, x2d, w_o,
      ln1_g.reshape(1, -1), ln1_b.reshape(1, -1),
      w_ff1, b_ff1.reshape(1, -1),
      w_ff2, b_ff2.reshape(1, -1),
      ln2_g.reshape(1, -1), ln2_b.reshape(1, -1))


# -----------------------------------------------------------------------------
# Full decoder-layer forward (eval mode, no mems / masks, post-lnorm).
# -----------------------------------------------------------------------------
def decoder_layer_forward(w, r, params, *, n_head, d_head, eps=1e-5, block_rows=256):
    qlen, bsz, d_model = w.shape
    rlen = r.shape[0]
    assert rlen == qlen, "no-mems path requires rlen == klen == qlen"
    HD = n_head * d_head
    scale = 1.0 / (d_head ** 0.5)

    # Batch-major activations: one cheap transpose in / one out; weights keep their
    # torch [dout, din] layout (contracted on the last dim inside the kernels).
    wb2d = jnp.transpose(w, (1, 0, 2)).reshape(bsz * qlen, d_model)

    w_heads = linear_rows(wb2d, params["w_qkv"], block_rows=block_rows)   # [B*Q, 3HD]
    r_head_k = linear_rows(r, params["w_r"], block_rows=block_rows)       # [rlen, HD]

    av = rel_attn_fused(w_heads.reshape(bsz, qlen, 3 * HD), r_head_k,
                        params["r_w_bias"].reshape(1, HD),
                        params["r_r_bias"].reshape(1, HD),
                        n_head=n_head, d_head=d_head, scale=scale)        # [B, Q, HD]

    out2d = post_attention_ffn(av.reshape(bsz * qlen, HD), wb2d,
                               params["w_o"], params["ln1_g"], params["ln1_b"],
                               params["w_ff1"], params["b_ff1"],
                               params["w_ff2"], params["b_ff2"],
                               params["ln2_g"], params["ln2_b"],
                               eps=eps, block_rows=block_rows)            # [B*Q, dm]
    return jnp.transpose(out2d.reshape(bsz, qlen, d_model), (1, 0, 2))


# -----------------------------------------------------------------------------
# Pure-JAX reference (faithful port of the PyTorch module, eval mode).
# -----------------------------------------------------------------------------
def reference_forward(w, r, params, *, n_head, d_head, eps=1e-5):
    qlen, bsz, d_model = w.shape
    rlen = r.shape[0]
    scale = 1.0 / (d_head ** 0.5)
    w_heads = w @ params["w_qkv"].T
    r_head_k = r @ params["w_r"].T
    q, k, v = jnp.split(w_heads, 3, axis=-1)
    klen = k.shape[0]
    q = q.reshape(qlen, bsz, n_head, d_head)
    k = k.reshape(klen, bsz, n_head, d_head)
    v = v.reshape(klen, bsz, n_head, d_head)
    rk = r_head_k.reshape(rlen, n_head, d_head)
    AC = jnp.einsum('ibnd,jbnd->ijbn', q + params["r_w_bias"], k)
    BD = jnp.einsum('ibnd,jnd->ijbn', q + params["r_r_bias"], rk)
    zp = jnp.zeros((qlen, 1, bsz, n_head), BD.dtype)
    BDp = jnp.concatenate([zp, BD], axis=1).reshape(rlen + 1, qlen, bsz, n_head)
    BD = BDp[1:].reshape(qlen, rlen, bsz, n_head)
    score = (AC + BD) * scale
    prob = jax.nn.softmax(score, axis=1)
    av = jnp.einsum('ijbn,jbnd->ibnd', prob, v).reshape(qlen, bsz, n_head * d_head)
    attn_out = av @ params["w_o"].T

    def ln(x, g, b):
        mu = x.mean(-1, keepdims=True)
        var = ((x - mu) ** 2).mean(-1, keepdims=True)
        return (x - mu) / jnp.sqrt(var + eps) * g + b

    a = ln(w + attn_out, params["ln1_g"], params["ln1_b"])
    h = jax.nn.relu(a @ params["w_ff1"].T + params["b_ff1"])
    core = h @ params["w_ff2"].T + params["b_ff2"]
    return ln(a + core, params["ln2_g"], params["ln2_b"])


# ---------------------------------- main --------------------------------------
if __name__ == "__main__":
    n_head, d_model, d_head, d_inner = 4, 32, 8, 64
    qlen, bsz = 8, 2
    rlen = qlen  # klen == rlen (no mems)
    eps = 1e-5

    key = jax.random.PRNGKey(0)
    ks = jax.random.split(key, 12)
    f32 = jnp.float32
    params = {
        "w_qkv": 0.02 * jax.random.normal(ks[0], (3 * n_head * d_head, d_model), f32),
        "w_r":   0.02 * jax.random.normal(ks[1], (n_head * d_head, d_model), f32),
        "w_o":   0.02 * jax.random.normal(ks[2], (d_model, n_head * d_head), f32),
        "r_r_bias": 0.02 * jax.random.normal(ks[3], (n_head, d_head), f32),
        "r_w_bias": 0.02 * jax.random.normal(ks[4], (n_head, d_head), f32),
        "ln1_g": jnp.ones((d_model,), f32),
        "ln1_b": jnp.zeros((d_model,), f32),
        "w_ff1": 0.02 * jax.random.normal(ks[5], (d_inner, d_model), f32),
        "b_ff1": 0.01 * jax.random.normal(ks[6], (d_inner,), f32),
        "w_ff2": 0.02 * jax.random.normal(ks[7], (d_model, d_inner), f32),
        "b_ff2": 0.01 * jax.random.normal(ks[8], (d_model,), f32),
        "ln2_g": jnp.ones((d_model,), f32),
        "ln2_b": jnp.zeros((d_model,), f32),
    }

    w = jax.random.normal(ks[9], (qlen, bsz, d_model), f32)
    r = jax.random.normal(ks[10], (rlen, d_model), f32)

    # block_rows=8 so the row-tiled kernels exercise multi-step (pipelined) grids
    # even at these tiny test shapes; at real sizes use the default (256).
    out = decoder_layer_forward(w, r, params, n_head=n_head, d_head=d_head,
                                eps=eps, block_rows=8)
    out = jax.block_until_ready(out)

    ref = reference_forward(w, r, params, n_head=n_head, d_head=d_head, eps=eps)
    assert out.shape == (qlen, bsz, d_model)
    assert jnp.allclose(out, ref, rtol=1e-4, atol=1e-4), \
        f"max abs err = {jnp.max(jnp.abs(out - ref))}"

    print("KERNEL_OK")
</pallas_src>

<mosaic_0001>
module attributes {stable_mosaic.version = 11 : i64} {
  func.func @_linear_kernel(%arg0: i32, %arg1: memref<8x32xf32, #tpu.memory_space<vmem>>, %arg2: memref<96x32xf32, #tpu.memory_space<vmem>>, %arg3: memref<8x96xf32, #tpu.memory_space<vmem>>) attributes {dimension_semantics = [#tpu.dimension_semantics<parallel>], iteration_bounds = array<i64: 2>, scalar_prefetch = 0 : i64, scratch_operands = 0 : i64, tpu.core_type = #tpu.core_type<tc>, window_params = [{transform_indices = @transform_0, window_bounds = array<i64: 8, 32>}, {pipeline_mode = #tpu.pipeline_mode<synchronous>, transform_indices = @transform_1, window_bounds = array<i64: 96, 32>}, {transform_indices = @transform_2, window_bounds = array<i64: 8, 96>}]} {
    %c0 = arith.constant 0 : index
    %c0_0 = arith.constant 0 : index
    %0 = vector.load %arg1[%c0, %c0_0] : memref<8x32xf32, #tpu.memory_space<vmem>>, vector<8x32xf32>
    %c0_1 = arith.constant 0 : index
    %c0_2 = arith.constant 0 : index
    %1 = vector.load %arg2[%c0_1, %c0_2] : memref<96x32xf32, #tpu.memory_space<vmem>>, vector<96x32xf32>
    %cst = arith.constant dense<0.000000e+00> : vector<8x96xf32>
    %2 = tpu.matmul %0, %1, %cst {dimension_numbers = #tpu.dot_dimension_numbers<[1], [1], [0], [0], [0, 0, 1, 0], [], []>} : vector<8x32xf32>, vector<96x32xf32>, vector<8x96xf32> -> vector<8x96xf32>
    %c0_3 = arith.constant 0 : index
    %c0_4 = arith.constant 0 : index
    %3 = vector.load %arg3[%c0_3, %c0_4] : memref<8x96xf32, #tpu.memory_space<vmem>>, vector<8x96xf32>
    tpu.vector_store %arg3[%c0_3, %c0_4], %2 {strides = array<i32>} : memref<8x96xf32, #tpu.memory_space<vmem>>, vector<8x96xf32>,
    return
  }
  func.func @transform_0(%arg0: i32) -> (i32, i32) {
    %c0_i32 = arith.constant 0 : i32
    %c0_i32_0 = arith.constant 0 : i32
    return %arg0, %c0_i32 : i32, i32
  }
  func.func @transform_1(%arg0: i32) -> (i32, i32) {
    %c0_i32 = arith.constant 0 : i32
    %c0_i32_0 = arith.constant 0 : i32
    %c0_i32_1 = arith.constant 0 : i32
    return %c0_i32, %c0_i32_0 : i32, i32
  }
  func.func @transform_2(%arg0: i32) -> (i32, i32) {
    %c0_i32 = arith.constant 0 : i32
    %c0_i32_0 = arith.constant 0 : i32
    return %arg0, %c0_i32 : i32, i32
  }
}

</mosaic_0001>

<bundles_post_ra>
// kernel: tpu_custom_call.1
= control target key start
LH: loop header
LB: loop body
LE: loop exit
PB: predicated region body
PF: predicated region fallthrough
CT: control target
= control target key end

     0   :  { %7 = vsyncpa [#allocation3], 0  ;;  %s704_s0 = inlined_call_operand.vmem [shape: f32[16,32], index: 0, kind: input, shape index: {}]   ;;  %s705_s1 = inlined_call_operand.vmem [shape: f32[96,32], index: 1, kind: input, shape index: {}]   ;;  %s706_s2 = inlined_call_operand.hbm [shape: f32[16,96], index: 2, kind: output, shape index: {}]  }
   0x1   :  { %9 = vsyncpa [#allocation3 + $0x1], 0  ;;  %s549_s9 = smov 0   ;;  %s551_s10 = smov 0  }
   0x2   :  { %s553_s11 = smov 0   ;;  %s555_s12 = smov 0  }
   0x3 LB: > { %s570_s13 = sadd.s32 4294967295, %s528_s12   ;;  %s337_s14 = sadd.s32 4294967294, %s528_s12   ;;  %s528_s12 = sphi %s555_s12, %s714_s12   ;;  %s524_s11 = sphi %s553_s11, %s713_s11   ;;  %s520_s10 = sphi %s551_s10, %s712_s10   ;;  %s516_s9 = sphi %s549_s9, %s711_s9  }
   0x4   : > { %s574_s15 = sadd.s32 1, %s528_s12   ;;  %s69_s16 = sadd.s32 1, %s524_s11 }
   0x5   : > { %s66_s17 = ssub.s32 %s528_s12, %s574_s15  ;;  %p79_p0 = scmp.ne.s32.totalorder %s524_s11, %s520_s10 }
   0x6   : > { %p67_p1 = scmp.eq.s32.totalorder %s66_s17, 0  ;;  %p80_p2 = scmp.eq.s32.totalorder %s570_s13, 1 }
   0x7   : > { %p85_p3 = scmp.ne.s32.totalorder %s520_s10, %s516_s9  ;;  %p86_p4 = scmp.eq.s32.totalorder %s337_s14, 1 }
   0x8   : > { %s585_s18 = scalar_select %p67_p1, %s524_s11, %s69_s16  }
   0x9   : > { %p587_p5 = por %p80_p2, %p79_p0  ;;  %p591_p6 = por %p86_p4, %p85_p3 }
   0xa   : > { %p340_p7 = scmp.ge.s32.totalorder %s528_s12, 1  ;;  %p114_p8 = scmp.lt.s32.totalorder %s528_s12, 3 }
   0xc   : > { %p115_p9 = pnand %p340_p7, %p114_p8 }
   0xd   : > { %v140_v0 = vld [vmem:[%s705_s1] sm:$0xff] (!%p115_p9)  ;;  %v141_v1 = vld [vmem:[%s705_s1 + $0x8] sm:$0xff] (!%p115_p9)  ;;  %vm152_vm0 = vcmask (!%p115_p9), 261120   ;;  %v530_v2 = vmov (!%p115_p9), 0.0|0.0   ;;  %vm531_vm2 = vmmov (!%p115_p9), 0   ;;  %v532_v5 = vmov (!%p115_p9), 0.0  }
   0xe   : > { %118 = sbr.rel (%p115_p9) target bundleno = 289 (0x121), region = 28  ;;  %400 = vmatprep.subr.bf16.mxu0 (!%p115_p9), %v530_v2  ;;  %v401_v3 = vpack.c.bf16 (!%p115_p9), %v141_v1, %v140_v0  ;;  %vm605_vm1 = vmpackc.low (!%p115_p9), %vm152_vm0, %vm152_vm0  ;;  %397 = vmatprep.mubr.msk.f32.mxu0 (!%p115_p9), %vm531_vm2, %v532_v5  ;;  %v142_v6 = vld [vmem:[%s705_s1 + $0x10] sm:$0xff] (!%p115_p9)  ;;  %v143_v7 = vld [vmem:[%s705_s1 + $0x18] sm:$0xff] (!%p115_p9)  ;;  %p135_p10 = scmp.lt.s32.totalorder (!%p115_p9), %s570_s13, 1  ;;  %vm262_vm3 = vcmask (!%p115_p9), 785408  }
   0xf   : > { %v405_v8 = vpack.c.bf16 (!%p115_p9), %v143_v7, %v142_v6  ;;  %v144_v9 = vld [vmem:[%s705_s1 + $0x20] sm:$0xff] (!%p115_p9)  ;;  %v145_v10 = vld [vmem:[%s705_s1 + $0x28] sm:$0xff] (!%p115_p9)  ;;  %v146_v12 = vld [vmem:[%s705_s1 + $0x30] sm:$0xff] (!%p115_p9)  ;;  %s132_s3 = sand.u32 (!%p115_p9), 1, %s520_s10   ;;  %s357_s5 = sshll.u32 (!%p115_p9), %s570_s13, 7 }
  0x10   : > { %403 = vmatpush3.bf16.xpose.msk.msra.mxu0 (!%p115_p9), %vm605_vm1, %v401_v3  ;;  %v409_v11 = vpack.c.bf16 (!%p115_p9), %v145_v10, %v144_v9  ;;  %v147_v13 = vld [vmem:[%s705_s1 + $0x38] sm:$0xff] (!%p115_p9)  ;;  %v148_v15 = vld [vmem:[%s705_s1 + $0x40] sm:$0xff] (!%p115_p9)  ;;  %v149_v16 = vld [vmem:[%s705_s1 + $0x48] sm:$0xff] (!%p115_p9)  ;;  %s341_s4 = sshll.u32 (!%p115_p9), %s132_s3, 3  ;;  %s662_s16 = scalar_lea.hbm (!%p115_p9), %s706_s2, %s357_s5 }
  0x11   : > { %404 = vmatprep.subr.bf16.mxu0 (!%p115_p9), %v530_v2  ;;  %v413_v14 = vpack.c.bf16 (!%p115_p9), %v147_v13, %v146_v12  ;;  %v417_v17 = vpack.c.bf16 (!%p115_p9), %v149_v16, %v148_v15  ;;  %v150_v18 = vld [vmem:[%s705_s1 + $0x50] sm:$0xff] (!%p115_p9)  ;;  %v151_v19 = vld [vmem:[%s705_s1 + $0x58] sm:$0xff] (!%p115_p9)  ;;  %s134_s6 = scalar_lea.vmem (!%p115_p9), [#allocation2], %s341_s4  ;;  %s265_s17 = scalar_lea.sflag (!%p115_p9), [#allocation3], %s132_s3 }
  0x12   : > { %v421_v20 = vpack.c.bf16 (!%p115_p9), %v151_v19, %v150_v18  ;;  %s278_s7 = sshll.u32 (!%p115_p9), %s134_s6, 4  ;;  %s664_s7 = int_to_ptr.vmem [resolvable:$true] %s278_s7 }
  0x13   : > { %s466_s21 = scalar_lea.vmem (!%p115_p9), %s664_s7, 128 }
  0x14   : > { %p467_p11 = scmp.ne.s32.totalorder (!%p115_p9), %s664_s7, %s466_s21 }
  0x15   : > { %s136_s26 = scalar_select %p135_p10, %s570_s13, 1 }
  0x16   : > { %p468_p12 = pnand %p467_p11, %p587_p5  ;;  %s533_s13 = smov [#allocation2]  }
  0x17   : > { %s342_s27 = sshll.u32 %s136_s26, 3  ;;  %s470_s22 = sshll.u32 %s533_s13, 4  ;;  %s471_s22 = int_to_ptr.vmem [resolvable:$false] %s470_s22 }
  0x18   : > { %407 = vmatpush3.bf16.xpose.msk.msra.mxu0 %vm605_vm1, %v405_v8  ;;  %s138_s30 = scalar_lea.vmem %s704_s0, %s342_s27  ;;  %p469_p13 = pneg %p468_p12 }
  0x19   : > { %408 = vmatprep.subr.bf16.mxu0 %v530_v2  ;;  %v139_v21 = vld [vmem:[%s138_s30] sm:$0xff]  ;;  %s472_s23 = scalar_lea.vmem %s471_s22, 256  ;;  %p473_p0 = scmp.lt.s32.totalorder %s664_s7, %s471_s22 }
  0x1a   : > { %p474_p1 = scmp.lt.s32.totalorder %s472_s23, %s466_s21 }
  0x1c   : > { %p475_p2 = por %p474_p1, %p473_p0 }
  0x1e   : > { %p476_p3 = pnand %p475_p2, %p469_p13 }
  0x20   : > { %411 = vmatpush3.bf16.xpose.msk.msra.mxu0 %vm605_vm1, %v409_v11 }
  0x21   : > { %412 = vmatprep.subr.bf16.mxu0 %v530_v2 }
  0x28   : > { %415 = vmatpush3.bf16.xpose.msk.msra.mxu0 %vm605_vm1, %v413_v14 }
  0x29   : > { %416 = vmatprep.subr.bf16.mxu0 %v530_v2 }
  0x30   : > { %419 = vmatpush3.bf16.xpose.msk.msra.mxu0 %vm605_vm1, %v417_v17 }
  0x31   : > { %420 = vmatprep.subr.bf16.mxu0 %v530_v2 }
  0x38   : > { %423 = vmatpush3.bf16.xpose.msk.msra.mxu0 %vm605_vm1, %v421_v20 }
  0x3f   : > { %398 = vmatmul.mubr.msk.f32.vlgmr.msra.gmra.mrb[0].mxu0 %vm152_vm0, %v139_v21 }
 0x112   : > { %v258_v22 = vpop.f32.mrb[0].mxu0 }
 0x113   : > { %263 = vst.msk [vmem:[%s134_s6] sm:$0xff] %vm262_vm3, %v258_v22  ;;  %v399_v23 = vpop.f32.mrb[1].mxu0 }
 0x114   : > { %479 = shalt.err (!%p476_p3)
}
 0x115   : > { %s480_s24 = scalar_lea.hbm %s662_s16, 128  ;;  %s484_s27 = scalar_lea.hbm %s706_s2, 256 }
 0x116   : > { %p481_p4 = scmp.ne.s32.totalorder %s662_s16, %s480_s24  ;;  %p485_p9 = scmp.lt.u32.totalorder %s662_s16, %s706_s2 }
 0x117   : > { %p486_p10 = scmp.lt.u32.totalorder %s484_s27, %s480_s24  ;;  %p488_p12 = scmp.lt.u32.totalorder %s480_s24, %s662_s16 }
 0x118   : > { %p482_p7 = pnand %p481_p4, %p587_p5 }
 0x119   : > { %p487_p11 = por %p486_p10, %p485_p9 }
 0x11a   : > { %p483_p8 = pneg %p482_p7 }
 0x11b   : > { %p489_p13 = por %p488_p12, %p487_p11 }
 0x11d   : > { %p490_p0 = pnand %p489_p13, %p483_p8 }
 0x11f   : > { %493 = shalt.err (!%p490_p0)
}
 0x120   : > { %424 = dma.vmem_to_hbm [thread:$0]  (%p587_p5), %s664_s7, 128, %s662_s16, %s265_s17  }
 0x121 PF: > { %p430_p1 = scmp.ge.s32.totalorder %s528_s12, 2  ;;  %s290_s30 = sand.u32 1, %s516_s9  }
 0x122   : > { %s291_s3 = scalar_lea.sflag [#allocation3], %s290_s30 }
 0x123   : > { %p427_p2 = pnand %p430_p1, %p591_p6 }
 0x125   : > { %511 = dma.done.wait (!%p427_p2), %s291_s3, 128  }
 0x126   : > { %513 = vsyncadd (!%p427_p2), %s291_s3, 4294967168  ;;  %p12_p3 = scmp.ge.s32.totalorder %s574_s15, 4   ;;  %s711_s9 = smov %s520_s10 }
 0x127   : > { %s712_s10 = smov %s524_s11  ;;  %s713_s11 = smov %s585_s18 }
 0x128   : > { %s714_s12 = smov %s574_s15  ;;  %14 = sbr.rel (!%p12_p3) target bundleno = 3 (0x3), region = 63 }
 0x12f   :  { %296 = vsyncpa [#allocation3], 1 }
 0x130   :  { %298 = vsyncpa [#allocation3 + $0x1], 1 }

</bundles_post_ra>
